<compile_context>
chip_gen: v7x
topology: tpu7x:2x2x1
jax: 0.10.0
libtpu: 0.0.40
codegen_flags: <defaults>
</compile_context>

<pallas_src>
import math

import numpy as np
import jax
import jax.numpy as jnp
from jax.experimental import pallas as pl
from jax.experimental.pallas import tpu as pltpu


_LANES = 128
_SUBLANES = 8
_MAX_ROW_TILE = 4096            # max folded rows per grid step
_TILE_ELEM_BUDGET = 1 << 20     # <=1M f32 output elems per tile (~4 MiB, x2 buffered)
_MAX_FOLD_LANES = 2048          # cap on the lcm(dim,128) lane fold width


def _round_up(a: int, m: int) -> int:
    return (a + m - 1) // m * m


def _sinusoidal_kernel(tbl_ref, x_ref, out_ref):
    # tbl_ref: (k+1, C) f32 resident constant.  Row g < k holds the full-width
    #          (sin|cos) frequency table on lanes [g*dim_pad, g*dim_pad+dim),
    #          zeros elsewhere (frequency selection doubles as the row fold).
    #          Row k holds the phase offsets (0 for sin lanes, pi/2 for cos).
    # x_ref:   (TB, k+1) f32: k consecutive batch timesteps per output row,
    #          plus a trailing constant-1 column that picks up the offset row.
    # out_ref: (TB, C) folded embeddings; C = k * dim_pad (multiple of 128).
    k = tbl_ref.shape[0] - 1
    if k == 1:
        # dim is a multiple of 128: one FMA on the VPU beats a K=2 matmul.
        x = x_ref[...]
        emb = tbl_ref[1:2, :] + x[:, 0:1] * tbl_ref[0:1, :]
    else:
        # Fold + phase offset as one small MXU matmul; full f32 precision so
        # the sin/cos arguments (t up to ~1e3, freqs down to ~1e-4) are exact.
        emb = jnp.dot(x_ref[...], tbl_ref[...],
                      preferred_element_type=jnp.float32,
                      precision=jax.lax.Precision.HIGHEST)
    out_ref[...] = jnp.sin(emb).astype(out_ref.dtype)     # sin(t + pi/2) == cos(t)


def sinusoidal_pos_emb(x: jax.Array, dim: int, out_dtype=jnp.float32) -> jax.Array:
    """Pallas TPU implementation of SinusoidalPosEmb(dim)(x).

    x: (B,) timesteps  ->  (B, dim) embeddings (out_dtype, default float32).
    """
    assert dim % 2 == 0, "dim must be even"
    assert dim >= 4, "dim must be >= 4 (dim == 2 divides by zero, as in torch)"

    b = int(x.shape[0])
    half = dim // 2
    scale = math.log(10000.0) / (half - 1)

    # Trace-time constants (numpy), mirroring the torch forward.
    freqs = np.exp(np.arange(half, dtype=np.float32) * np.float32(-scale))   # (half,)

    # Lane-density fold: pack k batch rows into one C-lane output row, with C a
    # multiple of 128 so every store is an unmasked full-width vst.
    lcm = dim * _LANES // math.gcd(dim, _LANES)
    if lcm <= _MAX_FOLD_LANES:
        dim_pad, k = dim, lcm // dim          # e.g. dim=32 -> k=4; dim=96 -> k=4
    else:
        dim_pad, k = _round_up(dim, _LANES), 1  # zero-frequency lane padding
    C = k * dim_pad

    # (k+1, C) table: k masked frequency rows + 1 phase-offset row.
    table = np.zeros((k + 1, C), np.float32)
    for g in range(k):
        base = g * dim_pad
        table[g, base:base + half] = freqs
        table[g, base + half:base + dim] = freqs
        table[k, base + half:base + dim] = np.float32(np.pi / 2)

    # Balanced row tiling over the folded rows (avoids padding waste), with the
    # double-buffered output tile capped at ~8 MiB -- safe on v7x (64 MiB VMEM)
    # and well inside v5e/v6e (128 MiB).
    rows = -(-b // k)
    max_tile = max(_SUBLANES,
                   min(_MAX_ROW_TILE,
                       (_TILE_ELEM_BUDGET // C) // _SUBLANES * _SUBLANES))
    n_steps = max(1, -(-rows // max_tile))
    tb = _round_up(-(-rows // n_steps), _SUBLANES)
    rows_pad = _round_up(rows, tb)
    b_pad = rows_pad * k

    x32 = x.astype(jnp.float32)
    if b_pad != b:
        x32 = jnp.pad(x32, (0, b_pad - b))
    xk = x32.reshape(rows_pad, k)
    xk = jnp.concatenate([xk, jnp.ones((rows_pad, 1), jnp.float32)], axis=1)

    grid = (rows_pad // tb,)
    out = pl.pallas_call(
        _sinusoidal_kernel,
        out_shape=jax.ShapeDtypeStruct((rows_pad, C), out_dtype),
        grid=grid,
        in_specs=[
            pl.BlockSpec((k + 1, C), lambda i: (0, 0)),     # resident freq/offset table
            pl.BlockSpec((tb, k + 1), lambda i: (i, 0)),    # batch-tiled timesteps (+1s)
        ],
        out_specs=pl.BlockSpec((tb, C), lambda i: (i, 0)),
        compiler_params=pltpu.CompilerParams(
            dimension_semantics=("parallel",),
            vmem_limit_bytes=32 * 1024 * 1024,
        ),
    )(jnp.asarray(table), xk)

    # Contiguous unfold of the k-row pack, then drop row / lane padding.
    out = out.reshape(rows_pad * k, dim_pad)
    if b_pad != b or dim_pad != dim:
        out = out[:b, :dim]
    return out


def _reference(x: jax.Array, dim: int) -> jax.Array:
    # Pure-JAX reference mirroring the PyTorch forward, for verification.
    half = dim // 2
    scale = math.log(10000.0) / (half - 1)
    freqs = jnp.exp(jnp.arange(half, dtype=jnp.float32) * -scale)
    emb = x.astype(jnp.float32)[:, None] * freqs[None, :]
    return jnp.concatenate([jnp.sin(emb), jnp.cos(emb)], axis=-1)


if __name__ == "__main__":
    key = jax.random.PRNGKey(0)
    k1, k2, k3 = jax.random.split(key, 3)

    # Small case: B=8 diffusion timesteps, hidden dim=32 (exercises the k=4
    # MXU fold and row padding up to one 8-sublane tile).
    b1, dim1 = 8, 32
    x1 = jax.random.randint(k1, (b1,), 0, 1000).astype(jnp.float32)
    out1 = jax.block_until_ready(sinusoidal_pos_emb(x1, dim1))
    ref1 = _reference(x1, dim1)
    assert out1.shape == (b1, dim1), out1.shape
    assert out1.dtype == jnp.float32, out1.dtype
    # cos is computed as sin(t + pi/2); at |t| ~ 1e3 the f32 phase add costs
    # ~ulp(t) ~ 6e-5 absolute, hence the slightly relaxed tolerance.
    assert jnp.allclose(out1, ref1, atol=2e-4, rtol=1e-4), "mismatch (small case)"

    # Moderate case: exercises balanced tiling / unpadded rows and the k=2 fold.
    b2, dim2 = 2500, 64
    x2 = jax.random.randint(k2, (b2,), 0, 1000).astype(jnp.float32)
    out2 = jax.block_until_ready(sinusoidal_pos_emb(x2, dim2))
    ref2 = _reference(x2, dim2)
    assert out2.shape == (b2, dim2), out2.shape
    assert out2.dtype == jnp.float32, out2.dtype
    assert jnp.allclose(out2, ref2, atol=2e-4, rtol=1e-4), "mismatch (tiled case)"

    # k == 1 path: dim a multiple of 128 (single-FMA VPU path, no matmul).
    b3, dim3 = 16, 128
    x3 = jax.random.randint(k3, (b3,), 0, 1000).astype(jnp.float32)
    out3 = jax.block_until_ready(sinusoidal_pos_emb(x3, dim3))
    ref3 = _reference(x3, dim3)
    assert out3.shape == (b3, dim3), out3.shape
    assert jnp.allclose(out3, ref3, atol=2e-4, rtol=1e-4), "mismatch (k=1 case)"

    print("KERNEL_OK")
</pallas_src>

<mosaic_0001>
module attributes {stable_mosaic.version = 11 : i64} {
  func.func @_sinusoidal_kernel(%arg0: i32, %arg1: memref<5x128xf32, #tpu.memory_space<vmem>>, %arg2: memref<8x5xf32, #tpu.memory_space<vmem>>, %arg3: memref<8x128xf32, #tpu.memory_space<vmem>>) attributes {dimension_semantics = [#tpu.dimension_semantics<parallel>], iteration_bounds = array<i64: 1>, scalar_prefetch = 0 : i64, scratch_operands = 0 : i64, tpu.core_type = #tpu.core_type<tc>, window_params = [{pipeline_mode = #tpu.pipeline_mode<synchronous>, transform_indices = @transform_0, window_bounds = array<i64: 5, 128>}, {transform_indices = @transform_1, window_bounds = array<i64: 8, 5>}, {transform_indices = @transform_2, window_bounds = array<i64: 8, 128>}]} {
    %c0 = arith.constant 0 : index
    %c0_0 = arith.constant 0 : index
    %0 = vector.load %arg2[%c0, %c0_0] : memref<8x5xf32, #tpu.memory_space<vmem>>, vector<8x5xf32>
    %c0_1 = arith.constant 0 : index
    %c0_2 = arith.constant 0 : index
    %1 = vector.load %arg1[%c0_1, %c0_2] : memref<5x128xf32, #tpu.memory_space<vmem>>, vector<5x128xf32>
    %cst = arith.constant dense<0.000000e+00> : vector<8x128xf32>
    %2 = tpu.matmul %0, %1, %cst {dimension_numbers = #tpu.dot_dimension_numbers<[1], [0], [0], [1], [0, 0, 1, 1], [], []>, precision = #tpu.contract_precision<fp32>} : vector<8x5xf32>, vector<5x128xf32>, vector<8x128xf32> -> vector<8x128xf32>
    %3 = math.sin %2 : vector<8x128xf32>
    %c0_3 = arith.constant 0 : index
    %c0_4 = arith.constant 0 : index
    %4 = vector.load %arg3[%c0_3, %c0_4] : memref<8x128xf32, #tpu.memory_space<vmem>>, vector<8x128xf32>
    tpu.vector_store %arg3[%c0_3, %c0_4], %3 {strides = array<i32>} : memref<8x128xf32, #tpu.memory_space<vmem>>, vector<8x128xf32>,
    return
  }
  func.func @transform_0(%arg0: i32) -> (i32, i32) {
    %c0_i32 = arith.constant 0 : i32
    %c0_i32_0 = arith.constant 0 : i32
    %c0_i32_1 = arith.constant 0 : i32
    return %c0_i32, %c0_i32_0 : i32, i32
  }
  func.func @transform_1(%arg0: i32) -> (i32, i32) {
    %c0_i32 = arith.constant 0 : i32
    %c0_i32_0 = arith.constant 0 : i32
    return %arg0, %c0_i32 : i32, i32
  }
  func.func @transform_2(%arg0: i32) -> (i32, i32) {
    %c0_i32 = arith.constant 0 : i32
    %c0_i32_0 = arith.constant 0 : i32
    return %arg0, %c0_i32 : i32, i32
  }
}

</mosaic_0001>

<bundles_post_ra>
// kernel: tpu_custom_call.1
= control target key start
LH: loop header
LB: loop body
LE: loop exit
PB: predicated region body
PF: predicated region fallthrough
CT: control target
= control target key end

     0   :  { %7 = vsyncpa [#allocation3], 0  ;;  %s848_s0 = inlined_call_operand.hbm [shape: f32[5,128], index: 0, kind: input, shape index: {}]   ;;  %s849_s1 = inlined_call_operand.hbm [shape: f32[8,5], index: 1, kind: input, shape index: {}]   ;;  %s850_s2 = inlined_call_operand.hbm [shape: f32[8,128], index: 2, kind: output, shape index: {}]  }
   0x1   :  { %8 = vsyncpa [#allocation6], 0 }
   0x2   :  { %9 = vsyncpa [#allocation4], 0  ;;  %s759_s9 = smov [#allocation2]   ;;  %s760_s11 = smov [#allocation5]  }
   0x3   :  { %s16_s10 = sshll.u32 %s759_s9, 4  ;;  %s26_s12 = sshll.u32 %s760_s11, 4  ;;  %s17_s10 = int_to_ptr.vmem [resolvable:$true] %s16_s10  ;;  %s27_s12 = int_to_ptr.vmem [resolvable:$true] %s26_s12 }
   0x4   :  { %s687_s15 = scalar_lea.hbm %s848_s0, 128 }
   0x5   :  { %p688_p0 = scmp.ne.s32.totalorder %s848_s0, %s687_s15  ;;  %p691_p1 = scmp.lt.u32.totalorder %s687_s15, %s848_s0 }
   0x7   :  { %p693_p2 = pnand %p691_p1, %p688_p0 }
   0x9   :  { %696 = shalt.err (!%p693_p2)
}
   0xa   :  { %s697_s20 = scalar_lea.vmem %s17_s10, 128  ;;  %p702_p4 = scmp.lt.s32.totalorder %s17_s10, %s17_s10 }
   0xb   :  { %p698_p3 = scmp.ne.s32.totalorder %s17_s10, %s697_s20  ;;  %p703_p5 = scmp.lt.s32.totalorder %s697_s20, %s697_s20 }
   0xd   :  { %p704_p6 = por %p703_p5, %p702_p4 }
   0xf   :  { %p705_p7 = pnand %p704_p6, %p698_p3 }
  0x11   :  { %708 = shalt.err (!%p705_p7)
}
  0x12   :  { %19 = dma.hbm_to_vmem [thread:$0]  %s848_s0, 128, %s17_s10, [#allocation3]  }
  0x13   :  { %s709_s25 = scalar_lea.hbm %s849_s1, 128 }
  0x14   :  { %p710_p8 = scmp.ne.s32.totalorder %s849_s1, %s709_s25  ;;  %p713_p9 = scmp.lt.u32.totalorder %s709_s25, %s849_s1 }
  0x16   :  { %p715_p10 = pnand %p713_p9, %p710_p8 }
  0x18   :  { %718 = shalt.err (!%p715_p10)
}
  0x19   :  { %s719_s30 = scalar_lea.vmem %s27_s12, 128  ;;  %p724_p12 = scmp.lt.s32.totalorder %s27_s12, %s27_s12 }
  0x1a   :  { %p720_p11 = scmp.ne.s32.totalorder %s27_s12, %s719_s30  ;;  %p725_p13 = scmp.lt.s32.totalorder %s719_s30, %s719_s30 }
  0x1c   :  { %p726_p0 = por %p725_p13, %p724_p12 }
  0x1e   :  { %p727_p1 = pnand %p726_p0, %p720_p11 }
  0x20   :  { %730 = shalt.err (!%p727_p1)
}
  0x21   :  { %29 = dma.hbm_to_vmem [thread:$0]  %s849_s1, 128, %s27_s12, [#allocation6]  }
  0x22   :  { %753 = dma.done.wait [#allocation3], 128  }
  0x23   :  { %754 = vsyncadd [#allocation3], 4294967168 }
  0x24   :  { %755 = dma.done.wait [#allocation6], 128  }
  0x25   :  { %756 = vsyncadd [#allocation6], 4294967168  ;;  %v761_v0 = vmov 0.0   ;;  %vm762_vm0 = vmmov 0   ;;  %vm42_vm1 = vcmask 1044480   ;;  %vm38_vm2 = vcmask 39936  }
  0x26   :  { %644 = vmatprep.subr.mxu0 %v761_v0  ;;  %646 = vmatprep.mubr.msk.f32.mxu0 %vm762_vm0, %v761_v0  ;;  %v37_v1 = vld [vmem:[#allocation2] sm:$0x1f]  ;;  %v36_v2 = vld [vmem:[#allocation5] sm:$0xff]  ;;  %v763_v30 = vmov 683565275   ;;  %s769_s1 = smov [#allocation7]  }
  0x27   :  { %629 = vmatprep.subr.mxu1 %v761_v0  ;;  %631 = vmatprep.mubr.msk.f32.mxu1 %vm762_vm0, %v761_v0  ;;  %v44_v3 = vsel %vm42_vm1, %v37_v1, 0  ;;  %v40_v4 = vsel %vm38_vm2, %v36_v2, 0  ;;  %v764_v32 = vmov 2475754826   ;;  %v765_v35 = vmov 2131351028  }
  0x28   :  { %v47_v5 = vand.u32 4294901760, %v44_v3  ;;  %v112_v6 = vand.u32 4294901760, %v40_v4  ;;  %v766_v38 = vmov 2102212464   ;;  %v767_v41 = vmov 920167782  }
  0x29   :  { %v768_v44 = vmov 1326507024   ;;  %s603_s4 = sshll.u32 %s769_s1, 4  ;;  %s604_s4 = int_to_ptr.vmem [resolvable:$true] %s603_s4 }
  0x2a   :  { %v124_v7 = vsub.f32 %v44_v3, %v47_v5  ;;  %645 = vmatpush3.msra.mxu0 %v47_v5  ;;  %v113_v8 = vsub.f32 %v40_v4, %v112_v6  ;;  %630 = vmatpush3.msra.mxu1 %v47_v5  ;;  %s731_s5 = scalar_lea.vmem %s604_s4, 128  ;;  %p736_p3 = scmp.lt.s32.totalorder %s604_s4, %s604_s4 }
  0x2b   :  { %634 = vmatprep.subr.mxu1 %v761_v0  ;;  %649 = vmatprep.subr.mxu0 %v761_v0  ;;  %p732_p2 = scmp.ne.s32.totalorder %s604_s4, %s731_s5  ;;  %p737_p4 = scmp.lt.s32.totalorder %s731_s5, %s731_s5 }
  0x2c   :  { %v114_v9 = vand.u32 4294901760, %v113_v8  ;;  %v125_v10 = vand.u32 4294901760, %v124_v7 }
  0x2d   :  { %p738_p5 = por %p737_p4, %p736_p3 }
  0x2e   :  { %647 = vmatmul.mubr.f32.vlgmr.msra.gmra.mrb[0].mxu0 %v114_v9  ;;  %v115_v11 = vsub.f32 %v113_v8, %v114_v9  ;;  %v126_v12 = vsub.f32 %v124_v7, %v125_v10 }
  0x2f   :  { %650 = vmatpush3.msra.mxu0 %v125_v10  ;;  %651 = vmatprep.mubr.msk.f32.mxu0 %vm762_vm0, %v761_v0  ;;  %p739_p6 = pnand %p738_p5, %p732_p2 }
  0x30   :  { %v116_v13 = vand.u32 4294901760, %v115_v11  ;;  %v127_v14 = vand.u32 4294901760, %v126_v12  ;;  %654 = vmatprep.subr.mxu0 %v761_v0 }
  0x32   :  { %632 = vmatmul.mubr.f32.vlgmr.msra.gmra.mrb[0].mxu1 %v116_v13 }
  0x33   :  { %635 = vmatpush3.msra.mxu1 %v127_v14  ;;  %636 = vmatprep.mubr.msk.f32.mxu1 %vm762_vm0, %v761_v0 }
  0x34   :  { %639 = vmatprep.subr.mxu1 %v761_v0 }
  0x36   :  { %652 = vmatmul.mubr.f32.vlgmr.msra.gmra.mrb[0].mxu0 %v112_v6 }
  0x37   :  { %655 = vmatpush3.msra.mxu0 %v47_v5  ;;  %656 = vmatprep.mubr.msk.f32.mxu0 %vm762_vm0, %v761_v0 }
  0x3a   :  { %637 = vmatmul.mubr.f32.vlgmr.msra.gmra.mrb[0].mxu1 %v112_v6 }
  0x3b   :  { %640 = vmatpush3.msra.mxu1 %v124_v7  ;;  %641 = vmatprep.mubr.msk.f32.mxu1 %vm762_vm0, %v761_v0 }
  0x3e   :  { %657 = vmatmul.mubr.f32.vlgmr.msra.gmra.mrb[0].mxu0 %v112_v6 }
  0x42   :  { %642 = vmatmul.mubr.f32.vlgmr.msra.gmra.mrb[0].mxu1 %v113_v8 }
 0x111   :  { %v488_v15 = vpop.f32.mrb[0].mxu0 }
 0x112   :  { %v658_v16 = vpop.f32.mrb[1].mxu0 }
 0x115   :  { %v268_v17 = vpop.f32.mrb[0].mxu1 }
 0x116   :  { %v815_v18 = vadd.f32 %v488_v15, %v268_v17  ;;  %v643_v19 = vpop.f32.mrb[1].mxu1 }
 0x118   :  { %v495_v20 = vand.u32 2139095040, %v815_v18  ;;  %v492_v24 = vand.u32 2147483647, %v815_v18  ;;  %vm494_vm10 = vcmp.lt.s32.totalorder %v815_v18, 0  ;;  %vm584_vm15 = vweird.f32 %v815_v18 }
 0x11a   :  { %v496_v21 = vshrl.u32 %v495_v20, 23  ;;  %v499_v27 = vand.u32 8388607, %v492_v24  ;;  %vm493_vm11 = vcmp.le.f32.partialorder %v492_v24, 0.7853982 }
 0x11c   :  { %v613_v22 = vadd.s32 4294967169, %v496_v21  ;;  %v500_v46 = vor.u32 8388608, %v499_v27 }
 0x11e   :  { %v502_v23 = vadd.s32 1, %v613_v22  ;;  %v540_v60 = vshll.u32 %v500_v46, 8 }
 0x120   :  { %vm503_vm3 = vcmp.gt.s32.totalorder %v502_v23, 0 }
 0x121   :  { %v504_v25 = vsel %vm503_vm3, %v502_v23, 0 }
 0x122   :  { %v506_v26 = vand.u32 31, %v504_v25  ;;  %v505_v29 = vshrl.u32 %v504_v25, 5 }
 0x124   :  { %v507_v28 = vsub.s32 32, %v506_v26  ;;  %v509_v31 = vshll.u32 %v763_v30, %v506_v26  ;;  %v512_v33 = vshll.u32 %v764_v32, %v506_v26  ;;  %v515_v37 = vshll.u32 %v765_v35, %v506_v26 }
 0x125   :  { %v518_v40 = vshll.u32 %v766_v38, %v506_v26  ;;  %v521_v43 = vshll.u32 %v767_v41, %v506_v26  ;;  %vm524_vm4 = vcmp.lt.s32.totalorder %v505_v29, 1  ;;  %vm527_vm5 = vcmp.lt.s32.totalorder %v505_v29, 4 }
 0x126   :  { %v510_v34 = vshrl.u32 %v764_v32, %v507_v28  ;;  %v513_v36 = vshrl.u32 %v765_v35, %v507_v28  ;;  %v516_v39 = vshrl.u32 %v766_v38, %v507_v28  ;;  %v519_v42 = vshrl.u32 %v767_v41, %v507_v28 }
 0x127   :  { %v522_v45 = vshrl.u32 %v768_v44, %v507_v28  ;;  %v508_v55 = vshrl.u32 %v763_v30, %v507_v28  ;;  %vm526_vm6 = vcmp.lt.s32.totalorder %v505_v29, 3  ;;  %vm525_vm7 = vcmp.lt.s32.totalorder %v505_v29, 2 }
 0x128   :  { %v511_v47 = vor.u32 %v510_v34, %v509_v31  ;;  %v514_v48 = vor.u32 %v513_v36, %v512_v33  ;;  %v517_v49 = vor.u32 %v516_v39, %v515_v37  ;;  %v520_v50 = vor.u32 %v519_v42, %v518_v40 }
 0x129   :  { %v523_v51 = vor.u32 %v522_v45, %v521_v43 }
 0x12a   :  { %v529_v52 = vsel %vm527_vm5, %v517_v49, 2102212464  ;;  %v532_v53 = vsel %vm524_vm4, %v511_v47, %v514_v48  ;;  %v536_v54 = vsel %vm524_vm4, %v514_v48, %v517_v49  ;;  %v533_v56 = vsel %vm527_vm5, %v520_v50, 920167782 }
 0x12b   :  { %v537_v57 = vsel %vm527_vm5, %v523_v51, 1326507024  ;;  %v534_v58 = vsel %vm526_vm6, %v517_v49, %v533_v56  ;;  %v528_v61 = vsel %vm524_vm4, %v508_v55, %v511_v47  ;;  %v530_v62 = vsel %vm526_vm6, %v514_v48, %v529_v52 }
 0x12c   :  { %v538_v59 = vsel %vm526_vm6, %v520_v50, %v537_v57  ;;  %v535_v63 = vsel %vm525_vm7, %v532_v53, %v534_v58  ;;  %v531_v5 = vsel %vm525_vm7, %v528_v61, %v530_v62 }
 0x12d   :  { %v539_v0 = vsel %vm525_vm7, %v536_v54, %v538_v59  ;;  %v824_v3 = vmul.u32.u64.low %v540_v60, %v535_v63  ;;  %v825_v4 = vmul.u32.u64.high %v540_v60, %v535_v63, %v824_v3  ;;  %v547_v7 = vmul.u32 %v540_v60, %v531_v5 }
 0x12e   :  { %v821_v1 = vmul.u32.u64.low %v540_v60, %v539_v0  ;;  %v822_v2 = vmul.u32.u64.high %v540_v60, %v539_v0, %v821_v1 }
 0x12f   :  { %v550_v6 = vadd.s32 1, %v825_v4 }
 0x130   :  { %vm549_vm8 = vc.u32 %v822_v2, %v824_v3  ;;  %v548_v20 = vadd.s32 %v824_v3, %v822_v2 }
 0x131   :  { %v551_v8 = vsel %vm549_vm8, %v550_v6, %v825_v4 }
 0x132   :  { %v552_v9 = vadd.s32 %v551_v8, %v547_v7 }
 0x134   :  { %v553_v10 = vadd.s32 536870912, %v552_v9 }
 0x136   :  { %v554_v11 = vshrl.u32 %v553_v10, 30 }
 0x138   :  { %v555_v12 = vshll.u32 %v554_v11, 30  ;;  %v578_v33 = vsub.s32 4, %v554_v11 }
 0x13a   :  { %v556_v13 = vsub.s32 %v552_v9, %v555_v12  ;;  %v579_v36 = vsel %vm494_vm10, %v578_v33, %v554_v11 }
 0x13b   :  { %v581_v38 = vsel %vm493_vm11, 0, %v579_v36 }
 0x13c   :  { %v558_v14 = vsub.s32 0, %v556_v13  ;;  %v585_v39 = vadd.s32 3, %v581_v38 }
 0x13e   :  { %v614_v15 = vmin.u32 %v558_v14, %v556_v13  ;;  %v586_v40 = vand.u32 3, %v585_v39 }
 0x140   :  { %v560_v16 = vclz %v614_v15  ;;  %vm591_vm12 = vcmp.eq.s32.totalorder %v586_v40, 2  ;;  %vm588_vm13 = vcmp.eq.s32.totalorder %v586_v40, 0  ;;  %vm587_vm14 = vcmp.lt.s32.totalorder %v586_v40, 2 }
 0x142   :  { %v615_v17 = vadd.s32 4294967294, %v560_v16 }
 0x144   :  { %vm616_vm9 = vcmp.lt.s32.totalorder %v615_v17, 0 }
 0x145   :  { %v563_v19 = vsel %vm616_vm9, 0, %v615_v17 }
 0x146   :  { %v564_v21 = vsub.s32 32, %v563_v19  ;;  %v568_v22 = vsub.s32 4294967266, %v563_v19  ;;  %v565_v23 = vshll.u32 %v556_v13, %v563_v19 }
 0x148   :  { %v566_v25 = vshrl.u32 %v548_v20, %v564_v21  ;;  %v569_v26 = vadd.s32 127, %v568_v22 }
 0x14a   :  { %v567_v27 = vor.u32 %v566_v25, %v565_v23  ;;  %v570_v28 = vshll.u32 %v569_v26, 23 }
 0x14c   :  { %v571_v29 = vor.u32 4788187, %v570_v28  ;;  %v574_v31 = vcvt.s32.f32 %v567_v27 }
 0x14e   :  { %v572_v30 = vand.u32 2147483647, %v571_v29 }
 0x150   :  { %v575_v32 = vmul.f32 %v574_v31, %v572_v30 }
 0x152   :  { %v576_v34 = vxor.u32 2147483648, %v575_v32 }
 0x154   :  { %v577_v35 = vsel %vm494_vm10, %v576_v34, %v575_v32 }
 0x155   :  { %v580_v37 = vsel %vm493_vm11, %v815_v18, %v577_v35 }
 0x156   :  { %683 = vcosq.f32 %v580_v37 }
 0x157   :  { %685 = vsinq.f32 %v580_v37 }
 0x160   :  { %v684_v41 = vpop.eup %683 }
 0x161   :  { %v686_v42 = vpop.eup %685  ;;  %v592_v43 = vxor.u32 2147483648, %v684_v41 }
 0x162   :  { %v589_v44 = vxor.u32 2147483648, %v686_v42 }
 0x163   :  { %v593_v45 = vsel %vm591_vm12, %v592_v43, %v686_v42 }
 0x164   :  { %v590_v46 = vsel %vm588_vm13, %v684_v41, %v589_v44 }
 0x165   :  { %v594_v24 = vsel %vm587_vm14, %v590_v46, %v593_v45 }
 0x166   :  { %v595_v47 = vsel %vm584_vm15, nan, %v594_v24 }
 0x167   :  { %596 = vst [vmem:[#allocation7] sm:$0xff] %v595_v47 }
 0x168   :  { %742 = shalt.err (!%p739_p6)
}
 0x169   :  { %s743_s8 = scalar_lea.hbm %s850_s2, 128 }
 0x16a   :  { %p744_p7 = scmp.ne.s32.totalorder %s850_s2, %s743_s8  ;;  %p747_p8 = scmp.lt.u32.totalorder %s743_s8, %s850_s2 }
 0x16c   :  { %p749_p9 = pnand %p747_p8, %p744_p7 }
 0x16e   :  { %752 = shalt.err (!%p749_p9)
}
 0x16f   :  { %606 = dma.vmem_to_hbm [thread:$0]  %s604_s4, 128, %s850_s2, [#allocation4]  }
 0x170   :  { %757 = dma.done.wait [#allocation4], 128  }
 0x171   :  { %758 = vsyncadd [#allocation4], 4294967168 }
 0x172   :  { %610 = vsyncpa [#allocation3], 1 }
 0x173   :  { %611 = vsyncpa [#allocation6], 1 }
 0x174   :  { %612 = vsyncpa [#allocation4], 1 }

</bundles_post_ra>
